<compile_context>
chip_gen: v7x
topology: tpu7x:2x2x1
jax: 0.10.0
libtpu: 0.0.40
codegen_flags: <defaults>
</compile_context>

<pallas_src>
import functools

import jax
import jax.numpy as jnp
from jax.experimental import pallas as pl
from jax.experimental.pallas import tpu as pltpu


def _round_up(x, m):
    return (x + m - 1) // m * m


_VMEM_CAP = None


def _vmem_cap_bytes():
    """75% of physical per-core VMEM (v5e/v6e: 96 MiB, v7x: 48 MiB); 48 MiB fallback."""
    global _VMEM_CAP
    if _VMEM_CAP is None:
        cap = 48 * 1024 * 1024
        try:
            info = pltpu.get_tpu_info()
            phys = int(getattr(info, "vmem_capacity_bytes", 0) or 0)
            if phys > 0:
                cap = min(phys * 3 // 4, 96 * 1024 * 1024)
        except Exception:
            pass
        _VMEM_CAP = cap
    return _VMEM_CAP


def _proloss_kernel(cf_ref, ctr_ref, labels_ref, target_ref, out_ref, *,
                    n_rows, n_classes):
    """One row-tile of the loss.

    cf_ref     : [TN, Dp]    contrast features (f32 or bf16), D zero-padded
    ctr_ref    : [Cp, Dp]    class centers, zero-padded to Cp = round_up(C, 128)
    labels_ref : [TN, 1]     int32 labels for this row tile
    target_ref : [1, Cp]     int32 center class ids, padded with -1
    out_ref    : [1, 8, 128] per-tile partial sum of -mean_log_prob_pos (broadcast)
    """
    tile = pl.program_id(0)

    # anchor_dot_contrast = contrast_feature @ fea_center.T  (MXU, f32 accumulation)
    adc = jax.lax.dot_general(
        cf_ref[...], ctr_ref[...],
        dimension_numbers=(((1,), (1,)), ((), ())),
        preferred_element_type=jnp.float32,
    )                                                            # [TN, Cp] f32
    tn, cpad = adc.shape

    # Padded center columns must not win the row max; skip entirely when C == Cp.
    if n_classes != cpad:
        col_valid = jax.lax.broadcasted_iota(jnp.int32, (1, cpad), 1) < n_classes
        adc = jnp.where(col_valid, adc, jnp.float32(-1e30))

    # Numerically-stable log-softmax pieces over the (true) center axis.
    logits_max = jnp.max(adc, axis=1, keepdims=True)             # [TN, 1]
    logits = adc - logits_max                                    # [TN, Cp]
    # exp(-1e30 - max) underflows to exactly 0 -> padded columns drop out of the sum.
    lse = jnp.log(jnp.sum(jnp.exp(logits), axis=1, keepdims=True))   # [TN, 1]

    # mask[r, c] = (labels[r] == target[c]); padded targets are -1 so they never match.
    mask = (labels_ref[...] == target_ref[...]).astype(jnp.float32)  # [TN, Cp]

    pos_logit_sum = jnp.sum(mask * logits, axis=1, keepdims=True)    # [TN, 1]
    pos_cnt = jnp.sum(mask, axis=1, keepdims=True)                   # [TN, 1]

    # sum(mask*(logits - lse))/cnt == sum(mask*logits)/cnt - lse  (no [TN,Cp] log_prob temp)
    # NaN iff a row matches no center (0/0) -- same behaviour as the PyTorch reference.
    mean_log_prob_pos = pos_logit_sum / pos_cnt - lse                # [TN, 1]

    # Rows beyond the true N (boundary tile) contribute zero.
    row_ids = jax.lax.broadcasted_iota(jnp.int32, (tn, 1), 0) + tile * tn
    contrib = jnp.where(row_ids < n_rows, -mean_log_prob_pos, 0.0)

    out_ref[...] = jnp.broadcast_to(jnp.sum(contrib), out_ref.shape)


@functools.partial(jax.jit, static_argnames=("block_rows",))
def pro_loss(features, fea_center, target, labels, *, block_rows=1024):
    """features: [B, V, D] (V=2), fea_center: [C, D], target: [C] int,
    labels: [V*B] int ordered like torch.cat(torch.unbind(features, 1), 0)."""
    B, V, D = features.shape
    N = B * V
    C = fea_center.shape[0]

    # The loss is a mean over rows, so any consistent row permutation is equivalent.
    # Use the zero-copy row-major reshape (batch-major interleaving) instead of the
    # concat copy, and permute the [N] labels to the matching order (tiny).
    cf = features.reshape(N, D)
    labels_il = labels.reshape(V, B).T.reshape(N)

    centers = fea_center
    if centers.dtype != cf.dtype:
        centers = centers.astype(cf.dtype)        # tiny [C, D]; enables bf16 MXU path

    # Pad contraction dim D to a multiple of 128 (lane-dense MXU operands) when unaligned.
    Dp = _round_up(D, 128)
    if Dp != D:
        cf = jnp.pad(cf, ((0, 0), (0, Dp - D)))
        centers = jnp.pad(centers, ((0, 0), (0, Dp - D)))

    # Pad the class axis (MXU output / lane dim) to a multiple of 128.
    Cp = _round_up(C, 128)
    centers = jnp.pad(centers, ((0, Cp - C), (0, 0)))
    target_row = jnp.pad(target.astype(jnp.int32).reshape(1, C),
                         ((0, 0), (0, Cp - C)), constant_values=-1)
    labels_col = labels_il.reshape(N, 1).astype(jnp.int32)

    # ---- row-tile sizing --------------------------------------------------------------
    itemsize = jnp.dtype(cf.dtype).itemsize
    sub = max(8, 32 // itemsize)                  # sublane pack: 8 for f32, 16 for bf16
    tn = min(_round_up(block_rows, sub), _round_up(N, sub))
    if N > sub:                                   # >= 2 grid steps when N allows (v7x 2-TC)
        tn = min(tn, _round_up(pl.cdiv(N, 2), sub))
    if tn >= 256:                                 # full MXU row occupancy (v6e/v7x 2x256^2)
        tn = _round_up(tn, 256)
    elif tn >= 128:                               # v5e 4x128^2
        tn = _round_up(tn, 128)

    # Per-grid-step VMEM estimate (double-buffered inputs, resident centers, f32 temps).
    # Centers kept at default double-buffering for portability; budgeted accordingly.
    def est_bytes(t):
        return (2 * t * Dp * itemsize             # feature tiles (double-buffered)
                + 2 * Cp * Dp * itemsize          # centers (resident)
                + 2 * t * 128 * 4                 # labels column (lane-padded)
                + 2 * 8 * Cp * 4                  # target row (sublane-padded)
                + 2 * 8 * 128 * 4                 # output blocks
                + 5 * t * Cp * 4)                 # f32 [t, Cp] temporaries

    cap = _vmem_cap_bytes()
    while tn > sub and est_bytes(tn) > cap:
        tn = max(sub, _round_up(tn // 2, sub))

    num_tiles = pl.cdiv(N, tn)
    vmem_limit = int(min(cap, max(32 * 1024 * 1024, 2 * est_bytes(tn))))

    kernel = functools.partial(_proloss_kernel, n_rows=N, n_classes=C)

    cost = pl.CostEstimate(
        flops=2 * N * Cp * Dp,
        transcendentals=N * Cp,
        bytes_accessed=(N * Dp * itemsize + Cp * Dp * itemsize
                        + N * 4 + Cp * 4 + num_tiles * 8 * 128 * 4),
    )

    partials = pl.pallas_call(
        kernel,
        out_shape=jax.ShapeDtypeStruct((num_tiles, 8, 128), jnp.float32),
        grid=(num_tiles,),
        in_specs=[
            pl.BlockSpec((tn, Dp), lambda i: (i, 0)),   # feature row tile (pipelined)
            pl.BlockSpec((Cp, Dp), lambda i: (0, 0)),   # centers, resident across steps
            pl.BlockSpec((tn, 1), lambda i: (i, 0)),    # labels row tile
            pl.BlockSpec((1, Cp), lambda i: (0, 0)),    # padded target row, resident
        ],
        out_specs=pl.BlockSpec((1, 8, 128), lambda i: (i, 0, 0)),
        compiler_params=pltpu.CompilerParams(
            dimension_semantics=("parallel",),
            vmem_limit_bytes=vmem_limit,
        ),
        cost_estimate=cost,
    )(cf, centers, labels_col, target_row)

    # The tile scalar is broadcast over the whole (8,128) block, so sum everything and
    # divide by 1024 — avoids a strided-slice gather in XLA. Final mean uses the true N.
    return jnp.sum(partials) / (jnp.float32(N) * 1024.0)


def _ref_loss(features, fea_center, target, labels):
    """Plain-JAX reference mirroring the PyTorch forward exactly."""
    B, V, D = features.shape
    cf = jnp.concatenate([features[:, v, :] for v in range(V)], axis=0)
    adc = cf @ fea_center.T
    logits = adc - jnp.max(adc, axis=1, keepdims=True)
    log_prob = logits - jnp.log(jnp.sum(jnp.exp(logits), axis=1, keepdims=True))
    mask = (labels.reshape(-1, 1) == target.reshape(1, -1)).astype(jnp.float32)
    mlpp = jnp.sum(mask * log_prob, axis=1) / jnp.sum(mask, axis=1)
    return jnp.mean(-mlpp)


if __name__ == "__main__":
    key = jax.random.PRNGKey(0)
    k1, k2, k3, k4, k5, k6 = jax.random.split(key, 6)

    # --- small test (single tile) ---
    B, V, D, C = 4, 2, 32, 8
    features = jax.random.normal(k1, (B, V, D), dtype=jnp.float32)
    fea_center = jax.random.normal(k2, (C, D), dtype=jnp.float32)
    target = jnp.arange(C, dtype=jnp.int32)
    labels = jax.random.randint(k3, (B * V,), 0, C, dtype=jnp.int32)

    loss = pro_loss(features, fea_center, target, labels)
    jax.block_until_ready(loss)
    ref = _ref_loss(features, fea_center, target, labels)
    assert jnp.allclose(loss, ref, rtol=1e-4, atol=1e-4), (loss, ref)

    # --- multi-tile test: non-divisible N exercises boundary-row masking ---
    B2, V2, D2, C2 = 37, 2, 48, 10
    features2 = jax.random.normal(k4, (B2, V2, D2), dtype=jnp.float32)
    fea_center2 = jax.random.normal(k5, (C2, D2), dtype=jnp.float32)
    target2 = jnp.arange(C2, dtype=jnp.int32)
    labels2 = jax.random.randint(k6, (B2 * V2,), 0, C2, dtype=jnp.int32)

    loss2 = pro_loss(features2, fea_center2, target2, labels2, block_rows=16)
    jax.block_until_ready(loss2)
    ref2 = _ref_loss(features2, fea_center2, target2, labels2)
    assert jnp.allclose(loss2, ref2, rtol=1e-4, atol=1e-4), (loss2, ref2)

    # --- bf16 fast path (bf16 MXU inputs, f32 accumulation), loose tolerance vs f32 ref ---
    loss_bf16 = pro_loss(features2.astype(jnp.bfloat16),
                         fea_center2.astype(jnp.bfloat16),
                         target2, labels2, block_rows=16)
    jax.block_until_ready(loss_bf16)
    assert jnp.allclose(loss_bf16.astype(jnp.float32), ref2, rtol=5e-2, atol=5e-2), (
        loss_bf16, ref2)

    print("KERNEL_OK")
</pallas_src>

<mosaic_0001>
module attributes {stable_mosaic.version = 11 : i64} {
  func.func @_proloss_kernel(%arg0: i32, %arg1: memref<8x128xf32, #tpu.memory_space<vmem>>, %arg2: memref<128x128xf32, #tpu.memory_space<vmem>>, %arg3: memref<8x1xi32, #tpu.memory_space<vmem>>, %arg4: memref<1x128xi32, #tpu.memory_space<vmem>>, %arg5: memref<1x8x128xf32, #tpu.memory_space<vmem>>) attributes {dimension_semantics = [#tpu.dimension_semantics<parallel>], iteration_bounds = array<i64: 1>, scalar_prefetch = 0 : i64, scratch_operands = 0 : i64, tpu.core_type = #tpu.core_type<tc>, window_params = [{transform_indices = @transform_0, window_bounds = array<i64: 8, 128>}, {pipeline_mode = #tpu.pipeline_mode<synchronous>, transform_indices = @transform_1, window_bounds = array<i64: 128, 128>}, {transform_indices = @transform_2, window_bounds = array<i64: 8, 1>}, {pipeline_mode = #tpu.pipeline_mode<synchronous>, transform_indices = @transform_3, window_bounds = array<i64: 1, 128>}, {transform_indices = @transform_4, window_bounds = array<i64: 1, 8, 128>}]} {
    %c0 = arith.constant 0 : index
    %c0_0 = arith.constant 0 : index
    %0 = vector.load %arg1[%c0, %c0_0] : memref<8x128xf32, #tpu.memory_space<vmem>>, vector<8x128xf32>
    %c0_1 = arith.constant 0 : index
    %c0_2 = arith.constant 0 : index
    %1 = vector.load %arg2[%c0_1, %c0_2] : memref<128x128xf32, #tpu.memory_space<vmem>>, vector<128x128xf32>
    %cst = arith.constant dense<0.000000e+00> : vector<8x128xf32>
    %2 = tpu.matmul %0, %1, %cst {dimension_numbers = #tpu.dot_dimension_numbers<[1], [1], [0], [0], [0, 0, 1, 0], [], []>} : vector<8x128xf32>, vector<128x128xf32>, vector<8x128xf32> -> vector<8x128xf32>
    %3 = tpu.iota {dimensions = array<i32: 1>} : vector<1x128xi32>
    %c8_i32 = arith.constant 8 : i32
    %4 = vector.broadcast %c8_i32 : i32 to vector<1x128xi32>
    %5 = arith.cmpi slt, %3, %4 : vector<1x128xi32>
    %cst_3 = arith.constant -1.000000e+30 : f32
    %6 = vector.shape_cast %5 : vector<1x128xi1> to vector<1x128xi1>
    %7 = vector.broadcast %6 : vector<1x128xi1> to vector<8x128xi1>
    %8 = vector.broadcast %cst_3 : f32 to vector<8x128xf32>
    %9 = arith.select %7, %2, %8 : vector<8x128xi1>, vector<8x128xf32>
    %cst_4 = arith.constant dense<0xFF800000> : vector<8xf32>
    %10 = vector.multi_reduction <maximumf>, %9, %cst_4 [1] : vector<8x128xf32> to vector<8xf32>
    %11 = vector.shape_cast %10 : vector<8xf32> to vector<8x1xf32>
    %12 = vector.broadcast %11 : vector<8x1xf32> to vector<8x128xf32>
    %13 = arith.subf %9, %12 : vector<8x128xf32>
    %14 = math.exp %13 : vector<8x128xf32>
    %cst_5 = arith.constant dense<0.000000e+00> : vector<8xf32>
    %15 = vector.multi_reduction <add>, %14, %cst_5 [1] : vector<8x128xf32> to vector<8xf32>
    %16 = vector.shape_cast %15 : vector<8xf32> to vector<8x1xf32>
    %17 = math.log %16 : vector<8x1xf32>
    %c0_6 = arith.constant 0 : index
    %c0_7 = arith.constant 0 : index
    %18 = vector.load %arg3[%c0_6, %c0_7] : memref<8x1xi32, #tpu.memory_space<vmem>>, vector<8x1xi32>
    %c0_8 = arith.constant 0 : index
    %c0_9 = arith.constant 0 : index
    %19 = vector.load %arg4[%c0_8, %c0_9] : memref<1x128xi32, #tpu.memory_space<vmem>>, vector<1x128xi32>
    %20 = vector.broadcast %18 : vector<8x1xi32> to vector<8x128xi32>
    %21 = vector.broadcast %19 : vector<1x128xi32> to vector<8x128xi32>
    %22 = arith.cmpi eq, %20, %21 : vector<8x128xi32>
    %23 = arith.extui %22 : vector<8x128xi1> to vector<8x128xi32>
    %24 = arith.sitofp %23 : vector<8x128xi32> to vector<8x128xf32>
    %25 = arith.mulf %24, %13 : vector<8x128xf32>
    %cst_10 = arith.constant dense<0.000000e+00> : vector<8xf32>
    %26 = vector.multi_reduction <add>, %25, %cst_10 [1] : vector<8x128xf32> to vector<8xf32>
    %27 = vector.shape_cast %26 : vector<8xf32> to vector<8x1xf32>
    %cst_11 = arith.constant dense<0.000000e+00> : vector<8xf32>
    %28 = vector.multi_reduction <add>, %24, %cst_11 [1] : vector<8x128xf32> to vector<8xf32>
    %29 = vector.shape_cast %28 : vector<8xf32> to vector<8x1xf32>
    %30 = arith.divf %27, %29 : vector<8x1xf32>
    %31 = arith.subf %30, %17 : vector<8x1xf32>
    %32 = tpu.iota {dimensions = array<i32: 0>} : vector<8x1xi32>
    %c8_i32_12 = arith.constant 8 : i32
    %33 = arith.muli %arg0, %c8_i32_12 : i32
    %34 = vector.broadcast %33 : i32 to vector<8x1xi32>
    %35 = arith.addi %32, %34 : vector<8x1xi32>
    %c8_i32_13 = arith.constant 8 : i32
    %36 = vector.broadcast %c8_i32_13 : i32 to vector<8x1xi32>
    %37 = arith.cmpi slt, %35, %36 : vector<8x1xi32>
    %cst_14 = arith.constant 0.000000e+00 : f32
    %38 = vector.broadcast %cst_14 : f32 to vector<8x1xf32>
    %39 = arith.subf %38, %31 : vector<8x1xf32>
    %cst_15 = arith.constant 0.000000e+00 : f32
    %40 = vector.broadcast %cst_15 : f32 to vector<8x1xf32>
    %41 = arith.select %37, %39, %40 : vector<8x1xi1>, vector<8x1xf32>
    %42 = vector.shape_cast %41 : vector<8x1xf32> to vector<1x8x1xf32>
    %cst_16 = arith.constant dense<0.000000e+00> : vector<1xf32>
    %43 = vector.multi_reduction <add>, %42, %cst_16 [1, 2] : vector<1x8x1xf32> to vector<1xf32>
    %44 = vector.shape_cast %43 : vector<1xf32> to vector<1x1x1xf32>
    %45 = vector.extract %44[0, 0, 0] : f32 from vector<1x1x1xf32>
    %46 = vector.broadcast %45 : f32 to vector<1x8x128xf32>
    %c0_17 = arith.constant 0 : index
    %c0_18 = arith.constant 0 : index
    %c0_19 = arith.constant 0 : index
    %47 = vector.load %arg5[%c0_17, %c0_18, %c0_19] : memref<1x8x128xf32, #tpu.memory_space<vmem>>, vector<1x8x128xf32>
    tpu.vector_store %arg5[%c0_17, %c0_18, %c0_19], %46 {strides = array<i32>} : memref<1x8x128xf32, #tpu.memory_space<vmem>>, vector<1x8x128xf32>,
    return
  }
  func.func @transform_0(%arg0: i32) -> (i32, i32) {
    %c0_i32 = arith.constant 0 : i32
    %c0_i32_0 = arith.constant 0 : i32
    return %arg0, %c0_i32 : i32, i32
  }
  func.func @transform_1(%arg0: i32) -> (i32, i32) {
    %c0_i32 = arith.constant 0 : i32
    %c0_i32_0 = arith.constant 0 : i32
    %c0_i32_1 = arith.constant 0 : i32
    return %c0_i32, %c0_i32_0 : i32, i32
  }
  func.func @transform_2(%arg0: i32) -> (i32, i32) {
    %c0_i32 = arith.constant 0 : i32
    %c0_i32_0 = arith.constant 0 : i32
    return %arg0, %c0_i32 : i32, i32
  }
  func.func @transform_3(%arg0: i32) -> (i32, i32) {
    %c0_i32 = arith.constant 0 : i32
    %c0_i32_0 = arith.constant 0 : i32
    %c0_i32_1 = arith.constant 0 : i32
    return %c0_i32, %c0_i32_0 : i32, i32
  }
  func.func @transform_4(%arg0: i32) -> (i32, i32, i32) {
    %c0_i32 = arith.constant 0 : i32
    %c0_i32_0 = arith.constant 0 : i32
    %c0_i32_1 = arith.constant 0 : i32
    return %arg0, %c0_i32, %c0_i32_0 : i32, i32, i32
  }
}

</mosaic_0001>

<bundles_post_ra>
// kernel: pro_loss.1
= control target key start
LH: loop header
LB: loop body
LE: loop exit
PB: predicated region body
PF: predicated region fallthrough
CT: control target
= control target key end

     0   :  { %v255_v0 = vmov 0.0|0.0   ;;  %vm256_vm0 = vmmov 0   ;;  %v257_v3 = vmov 0.0   ;;  %v258_v27 = vmov 0   ;;  %s346_s1 = inlined_call_operand.vmem [shape: f32[128,128], index: 1, kind: input, shape index: {}]   ;;  %s347_s0 = inlined_call_operand.vmem [shape: f32[8,128], index: 0, kind: input, shape index: {}]   ;;  %s348_s2 = inlined_call_operand.vmem [shape: s32[8,1], index: 2, kind: input, shape index: {}]   ;;  %s349_s3 = inlined_call_operand.vmem [shape: s32[1,128], index: 3, kind: input, shape index: {}]   ;;  %s350_s4 = inlined_call_operand.vmem [shape: f32[1,8,128], index: 4, kind: output, shape index: {}]  }
   0x1   :  { %218 = vmatprep.subr.bf16.mxu0 %v255_v0  ;;  %v18_v1 = vld [vmem:[%s346_s1] sm:$0xff]  ;;  %v19_v2 = vld [vmem:[%s346_s1 + $0x8] sm:$0xff]  ;;  %215 = vmatprep.mubr.msk.f32.mxu0 %vm256_vm0, %v257_v3  ;;  %v20_v5 = vld [vmem:[%s346_s1 + $0x10] sm:$0xff]  ;;  %v104_v28 = vlaneseq  ;;  %vm147_vm3 = vcmask 7168  }
   0x2   :  { %v219_v4 = vpack.c.bf16 %v19_v2, %v18_v1  ;;  %v21_v6 = vld [vmem:[%s346_s1 + $0x18] sm:$0xff]  ;;  %v22_v8 = vld [vmem:[%s346_s1 + $0x20] sm:$0xff]  ;;  %v23_v9 = vld [vmem:[%s346_s1 + $0x28] sm:$0xff]  ;;  %248 = vset.pattern.permute.xlu0 %v258_v27 }
   0x3   :  { %v222_v7 = vpack.c.bf16 %v21_v6, %v20_v5  ;;  %v225_v10 = vpack.c.bf16 %v23_v9, %v22_v8  ;;  %v24_v11 = vld [vmem:[%s346_s1 + $0x30] sm:$0xff]  ;;  %v25_v12 = vld [vmem:[%s346_s1 + $0x38] sm:$0xff]  ;;  %v26_v14 = vld [vmem:[%s346_s1 + $0x40] sm:$0xff]  ;;  %v105_v29 = vand.u32 127, %v104_v28 }
   0x4   :  { %220 = vmatpush3.bf16.xpose.msra.mxu0 %v219_v4  ;;  %v228_v13 = vpack.c.bf16 %v25_v12, %v24_v11  ;;  %v27_v15 = vld [vmem:[%s346_s1 + $0x48] sm:$0xff]  ;;  %v28_v17 = vld [vmem:[%s346_s1 + $0x50] sm:$0xff]  ;;  %v29_v18 = vld [vmem:[%s346_s1 + $0x58] sm:$0xff] }
   0x5   :  { %221 = vmatprep.subr.bf16.mxu0 %v255_v0  ;;  %v231_v16 = vpack.c.bf16 %v27_v15, %v26_v14  ;;  %v234_v19 = vpack.c.bf16 %v29_v18, %v28_v17  ;;  %v30_v20 = vld [vmem:[%s346_s1 + $0x60] sm:$0xff]  ;;  %v31_v21 = vld [vmem:[%s346_s1 + $0x68] sm:$0xff]  ;;  %v32_v23 = vld [vmem:[%s346_s1 + $0x70] sm:$0xff]  ;;  %vm106_vm1 = vcmp.lt.s32.totalorder %v105_v29, 8 }
   0x6   :  { %v237_v22 = vpack.c.bf16 %v31_v21, %v30_v20  ;;  %v33_v24 = vld [vmem:[%s346_s1 + $0x78] sm:$0xff]  ;;  %v17_v26 = vld [vmem:[%s347_s0] sm:$0xff] }
   0x7   :  { %v240_v25 = vpack.c.bf16 %v33_v24, %v32_v23  ;;  %v119_v33 = vld [vmem:[%s348_s2] sm:$0xff] }
   0x8   :  { %v164_v37 = vld [vmem:[%s349_s3] ss:$0 sm:$0xff] }
   0xc   :  { %223 = vmatpush3.bf16.xpose.msra.mxu0 %v222_v7 }
   0xd   :  { %224 = vmatprep.subr.bf16.mxu0 %v255_v0 }
  0x14   :  { %226 = vmatpush3.bf16.xpose.msra.mxu0 %v225_v10 }
  0x15   :  { %227 = vmatprep.subr.bf16.mxu0 %v255_v0 }
  0x1c   :  { %229 = vmatpush3.bf16.xpose.msra.mxu0 %v228_v13 }
  0x1d   :  { %230 = vmatprep.subr.bf16.mxu0 %v255_v0 }
  0x24   :  { %232 = vmatpush3.bf16.xpose.msra.mxu0 %v231_v16 }
  0x25   :  { %233 = vmatprep.subr.bf16.mxu0 %v255_v0 }
  0x2c   :  { %235 = vmatpush3.bf16.xpose.msra.mxu0 %v234_v19 }
  0x2d   :  { %236 = vmatprep.subr.bf16.mxu0 %v255_v0 }
  0x34   :  { %238 = vmatpush3.bf16.xpose.msra.mxu0 %v237_v22 }
  0x35   :  { %239 = vmatprep.subr.bf16.mxu0 %v255_v0 }
  0x3c   :  { %241 = vmatpush3.bf16.xpose.msra.mxu0 %v240_v25 }
  0x43   :  { %216 = vmatmul.mubr.f32.vlgmr.msra.gmra.mrb[0].mxu0 %v17_v26 }
 0x116   :  { %v100_v30 = vpop.f32.mrb[0].mxu0 }
 0x117   :  { %v217_v31 = vpop.f32.mrb[1].mxu0  ;;  %v109_v32 = vsel %vm106_vm1, %v100_v30, -1e+30 }
 0x118   :  { %110 = vmax.xlane.f32.xlu0 %v109_v32 }
 0x12e   :  { %122 = vperm.xlu0 %248, %v119_v33  }
 0x1a5   :  { %v111_v34 = vpop.xlane.xlu0 %110 }
 0x1a6   :  { %v112_v35 = vsub.f32 %v109_v32, %v111_v34 }
 0x1a8   :  { %v113_v36 = vmul.f32 1.442695, %v112_v35 }
 0x1aa   :  { %249 = vpow2.f32 %v113_v36 }
 0x1ad   :  { %v123_v38 = vpop.permute.xlu0 %122 }
 0x1ae   :  { %vm128_vm2 = vcmp.eq.s32.totalorder %v123_v38, %v164_v37 }
 0x1af   :  { %v165_v40 = vsel %vm128_vm2, 1.0, %v257_v3 }
 0x1b0   :  { %v131_v41 = vmul.f32 %v165_v40, %v112_v35 }
 0x1b4   :  { %v250_v39 = vpop.eup %249 }
 0x1b5   :  { %115 = vadd.xlane.f32.xlu1 %v250_v39 }
 0x1b9   :  { %134 = vadd.xlane.f32.xlu1 %v165_v40 }
 0x1bd   :  { %132 = vadd.xlane.f32.xlu1 %v131_v41 }
 0x242   :  { %v116_v42 = vpop.xlane.xlu1 %115 }
 0x243   :  { %251 = vlog2.f32 %v116_v42 }
 0x246   :  { %v135_v43 = vpop.xlane.xlu1 %134 }
 0x247   :  { %253 = vrcp.f32 %v135_v43 }
 0x24a   :  { %v133_v46 = vpop.xlane.xlu1 %132 }
 0x24d   :  { %v252_v44 = vpop.eup %251 }
 0x24e   :  { %v118_v47 = vmul.f32 0.6931472, %v252_v44 }
 0x251   :  { %v254_v45 = vpop.eup %253 }
 0x252   :  { %v137_v48 = vmul.f32 %v254_v45, %v133_v46 }
 0x254   :  { %v138_v49 = vsub.f32 %v137_v48, %v118_v47 }
 0x256   :  { %v145_v50 = vsub.f32 0.0, %v138_v49 }
 0x258   :  { %v148_v51 = vsel %vm147_vm3, %v145_v50, 0.0 }
 0x259   :  { %149 = vadd.xlane.f32.xlu1 %v148_v51 }
 0x2e6   :  { %v150_v52 = vpop.xlane.xlu1 %149 }
 0x2e7   :  { %v151_v53 = vrot.slane %v150_v52, 4 }
 0x2e9   :  { %v152_v54 = vadd.f32 %v151_v53, %v150_v52 }
 0x2eb   :  { %v153_v55 = vrot.slane %v152_v54, 2 }
 0x2ed   :  { %v154_v56 = vadd.f32 %v153_v55, %v152_v54 }
 0x2ef   :  { %v155_v57 = vrot.slane %v154_v56, 1 }
 0x2f1   :  { %v156_v58 = vadd.f32 %v155_v57, %v154_v56 }
 0x2f3   :  { %242 = vpush %v156_v58 }
 0x324   :  { %s243_s2 = spop %242 }
 0x325   :  { %v158_v59 = vstv %s243_s2 }
 0x326   :  { %159 = vst [vmem:[%s350_s4] sm:$0xff] %v158_v59 }

</bundles_post_ra>
